<compile_context>
chip_gen: v7x
topology: tpu7x:2x2x1
jax: 0.10.0
libtpu: 0.0.40
codegen_flags: <defaults>
</compile_context>

<pallas_src>
import itertools
import math

import jax
import jax.numpy as jnp
import numpy as np
from jax.experimental import pallas as pl
from jax.experimental.pallas import tpu as pltpu


# ----------------------------------------------------------------------------
# Parameter setup (mirrors Axon_layer.__init__ / reset_parameters)
# ----------------------------------------------------------------------------
def to_decard_idx(angle, size):
    # exact transcription of Axon_layer.to_decard_idx
    a = jnp.arcsin(jnp.sin(angle))
    b = jnp.cos(angle)
    c = (1.0 - jnp.sin(angle) ** 2 + 1e-06) ** 0.5
    f = a * b / c
    f = 2.0 * f / jnp.pi
    f = f + 1.0
    f = f / 2.0
    f = f * (size - 1)
    return f


def make_params(key, input_size, output_size, num_sinapse, window_width):
    S = num_sinapse
    H_in, W_in = input_size
    kw, k0, k1 = jax.random.split(key, 3)
    # nn.init.uniform_(synapses_weight, a=-1, b=1)
    weight = jax.random.uniform(kw, (S, H_in, W_in), jnp.float32, minval=-1.0, maxval=1.0)
    # synapses_coordinates: one (S, H_in, W_in) tensor per output dim, uniform [0, pi)
    coords = [
        jax.random.uniform(k0, (S, H_in, W_in), jnp.float32) * jnp.pi,
        jax.random.uniform(k1, (S, H_in, W_in), jnp.float32) * jnp.pi,
    ]
    # give_window(window_width, num_dim)
    deltas = list(itertools.product(*[list(range(-window_width, window_width + 1))] * len(output_size)))
    return weight, coords, deltas


def precompute_targets(coords, deltas, output_size, window_width):
    """Target indices + gating weights ('src').  Pure function of parameters."""
    ndim = len(output_size)
    tgt = []
    for dim in range(ndim):
        per_k = []
        for delta in deltas:
            delta_idx = coords[dim] + math.pi * delta[dim] / (output_size[dim] - 1)
            dec = to_decard_idx(delta_idx, output_size[dim])
            per_k.append(jnp.round(dec).astype(jnp.int32))
        tgt.append(jnp.stack(per_k, axis=-1))  # (S, H_in, W_in, K)

    dist2 = 0.0
    for dim in range(ndim):
        # NOTE: intentionally reproduces the original module: the leftover loop
        # variable `dim` from the torch zip-loop equals the LAST output dim, so
        # output_size[-1] is used for every axis here. Do NOT "fix" this.
        dec = to_decard_idx(coords[dim], output_size[-1])
        dist2 = dist2 + (tgt[dim].astype(jnp.float32) - dec[..., None]) ** 2
    dist = jnp.sqrt(dist2)
    src = 6.0 * (window_width - 2.0 * dist) / window_width
    src = 1.0 / (1.0 + jnp.exp(-src))  # (S, H_in, W_in, K)
    return tgt[0], tgt[1], src


# ----------------------------------------------------------------------------
# Generation-aware tiling plan
# ----------------------------------------------------------------------------
def _round_up(x, m):
    return ((x + m - 1) // m) * m


def _device_caps():
    kind = ""
    try:
        kind = jax.devices()[0].device_kind.lower()
    except Exception:
        pass
    if "v7" in kind:
        # v7x: 64 MiB physical VMEM per TC, 2 TensorCores/chip -> keep 512 tiles,
        # <=32 MiB scoped VMEM, and try to give the q axis >=2 parallel tiles.
        return dict(b_cap=256, hw_cap=512, q_cap=512, vmem_cap=32 << 20, two_tc=True)
    if ("v5e" in kind) or ("v5 lite" in kind) or ("v5litepod" in kind):
        # v5e: 128 MiB VMEM, 128-row MXU; default scoped VMEM limit is only 16 MiB,
        # so an explicit vmem_limit_bytes is mandatory for the bigger tiles.
        return dict(b_cap=128, hw_cap=1024, q_cap=1024, vmem_cap=64 << 20, two_tc=False)
    # v6e (and default): 128 MiB VMEM, 256-row MXU.
    return dict(b_cap=256, hw_cap=1024, q_cap=1024, vmem_cap=64 << 20, two_tc=False)


def plan_tiles(B, HW, Q, caps):
    """Pick tiles first, then pad extents up to tile multiples."""
    b_tile = min(_round_up(B, 8), caps["b_cap"])
    hw_tile = min(_round_up(HW, 128), caps["hw_cap"])
    q_tile = min(_round_up(Q, 128), caps["q_cap"])
    B_pad = _round_up(B, b_tile)
    HW_pad = _round_up(HW, hw_tile)
    Q_pad = _round_up(Q, q_tile)
    # v7x: make sure at least one "parallel" axis has >=2 iterations so the
    # second TensorCore gets work.
    if caps["two_tc"] and B_pad // b_tile == 1 and Q_pad // q_tile == 1 and Q_pad >= 256:
        q_tile = _round_up(Q_pad // 2, 128)
        while Q_pad % q_tile:
            q_tile -= 128
    return b_tile, hw_tile, q_tile, B_pad, HW_pad, Q_pad


# ----------------------------------------------------------------------------
# Parameter-only folded scatter matrix (plain JAX, built once at setup time)
# ----------------------------------------------------------------------------
def build_folded_scatter(weight, row_t, col_t, src_t, output_size, hw_pad, q_pad,
                         dtype=jnp.float32):
    """M'[hw, q] = sum_s sum_k weight[s,hw]*src[s,hw,k]*onehot(row*W_out+col == q).

    Weight is folded in (exact for the forward pass).  If weight is trainable,
    refold after every weight update.
    """
    S, H_in, W_in, K = src_t.shape
    H_out, W_out = output_size
    HW, Q = H_in * W_in, H_out * W_out
    assert hw_pad >= HW and q_pad >= Q
    q_idx = (row_t * W_out + col_t).reshape(S, HW, K)            # int32, in [0, Q)
    contrib = (weight.reshape(S, HW, 1).astype(jnp.float32)
               * src_t.reshape(S, HW, K).astype(jnp.float32))    # (S, HW, K)
    hw_idx = jnp.broadcast_to(jnp.arange(HW)[None, :, None], q_idx.shape)
    M = jnp.zeros((hw_pad, q_pad), jnp.float32)
    # duplicates across (s, k) accumulate, exactly like index_put(accumulate=True)
    M = M.at[hw_idx, q_idx].add(contrib)
    return M.astype(dtype)


# ----------------------------------------------------------------------------
# Pallas kernel: out[b, q] += sig[b, hw] @ M'[hw, q]   (single MXU matmul/step)
# ----------------------------------------------------------------------------
def axon_kernel(sig_ref, m_ref, out_ref):
    h = pl.program_id(2)

    @pl.when(h == 0)
    def _init():
        out_ref[...] = jnp.zeros_like(out_ref)

    sig = sig_ref[...]
    m = m_ref[...]
    if sig.dtype != m.dtype:          # only triggers if M' is stored in bf16
        sig = sig.astype(m.dtype)
    # out block index is constant across h -> out_ref is the f32 accumulator.
    out_ref[...] += jnp.dot(sig, m, preferred_element_type=jnp.float32)


def axon_forward(signal, M, output_size, tiles):
    B, H_in, W_in = signal.shape
    HW = H_in * W_in
    H_out, W_out = output_size
    Q = H_out * W_out
    b_tile, hw_tile, q_tile, B_pad, HW_pad, Q_pad = tiles
    assert M.shape == (HW_pad, Q_pad)

    # glue padding/reshape only (zero pads => provably zero contribution)
    sig2 = jnp.pad(signal.reshape(B, HW).astype(jnp.float32),
                   ((0, B_pad - B), (0, HW_pad - HW)))

    grid = (B_pad // b_tile, Q_pad // q_tile, HW_pad // hw_tile)

    m_item = jnp.dtype(M.dtype).itemsize
    block_bytes = (2 * (b_tile * hw_tile * 4 + hw_tile * q_tile * m_item)  # double-buffered inputs
                   + 2 * b_tile * q_tile * 4)                               # output
    caps = _device_caps()
    vmem_limit = int(min(max(block_bytes + (4 << 20), 16 << 20), caps["vmem_cap"]))

    out = pl.pallas_call(
        axon_kernel,
        out_shape=jax.ShapeDtypeStruct((B_pad, Q_pad), jnp.float32),
        grid=grid,
        in_specs=[
            pl.BlockSpec((b_tile, hw_tile), lambda b, q, h: (b, h)),   # signal
            pl.BlockSpec((hw_tile, q_tile), lambda b, q, h: (h, q)),   # folded scatter M'
        ],
        out_specs=pl.BlockSpec((b_tile, q_tile), lambda b, q, h: (b, q)),
        compiler_params=pltpu.CompilerParams(
            dimension_semantics=("parallel", "parallel", "arbitrary"),
            vmem_limit_bytes=vmem_limit),
    )(sig2, M)

    return out[:B, :Q].reshape(B, H_out, W_out)


# ----------------------------------------------------------------------------
# Plain-JAX reference (mirrors torch: einsum + index_put(accumulate=True))
# ----------------------------------------------------------------------------
def axon_reference(signal, weight, row_t, col_t, src_t, output_size):
    B = signal.shape[0]
    H_out, W_out = output_size
    sig_e = jnp.einsum('shw,zhw->zshw', weight, signal)      # weight "einsum" signal
    contrib = sig_e[..., None] * src_t[None]                 # (B, S, H, W, K)
    b_idx = jnp.broadcast_to(jnp.arange(B).reshape(B, 1, 1, 1, 1), contrib.shape)
    r_idx = jnp.broadcast_to(row_t[None], contrib.shape)
    c_idx = jnp.broadcast_to(col_t[None], contrib.shape)
    out = jnp.zeros((B, H_out, W_out), jnp.float32)
    out = out.at[b_idx, r_idx, c_idx].add(contrib)
    return out


if __name__ == "__main__":
    # small, forward-consistent shapes
    input_size = (8, 8)      # (H_in, W_in)
    output_size = (8, 16)    # (H_out, W_out) -> Q = 128 (one full lane group)
    num_sinapse = 3
    window_width = 1         # K = 9 displacements
    B = 2

    key = jax.random.PRNGKey(0)
    kparams, ksig = jax.random.split(key)
    weight, coords, deltas = make_params(kparams, input_size, output_size,
                                         num_sinapse, window_width)
    row_t, col_t, src_t = precompute_targets(coords, deltas, output_size, window_width)

    caps = _device_caps()
    H_in, W_in = input_size
    H_out, W_out = output_size
    tiles = plan_tiles(B, H_in * W_in, H_out * W_out, caps)
    _, _, _, _, HW_pad, Q_pad = tiles

    # Parameter-only, built once at setup (weight folded in; refold if weight trains).
    # TODO(synk): if training, refold M' after each weight update (cheap JAX scatter).
    M = build_folded_scatter(weight, row_t, col_t, src_t, output_size,
                             HW_pad, Q_pad, dtype=jnp.float32)

    signal = jax.random.normal(ksig, (B,) + input_size, jnp.float32)

    out = axon_forward(signal, weight=None if False else M, output_size=output_size, tiles=tiles) \
        if False else axon_forward(signal, M, output_size, tiles)
    out = jax.block_until_ready(out)

    ref = axon_reference(signal, weight, row_t, col_t, src_t, output_size)
    np.testing.assert_allclose(np.asarray(out), np.asarray(ref), rtol=1e-4, atol=1e-4)
    print("KERNEL_OK")
</pallas_src>

<mosaic_0001>
module attributes {stable_mosaic.version = 11 : i64} {
  func.func @axon_kernel(%arg0: i32, %arg1: i32, %arg2: i32, %arg3: memref<8x128xf32, #tpu.memory_space<vmem>>, %arg4: memref<128x128xf32, #tpu.memory_space<vmem>>, %arg5: memref<8x128xf32, #tpu.memory_space<vmem>>) attributes {dimension_semantics = [#tpu.dimension_semantics<parallel>, #tpu.dimension_semantics<parallel>, #tpu.dimension_semantics<arbitrary>], iteration_bounds = array<i64: 1, 1, 1>, scalar_prefetch = 0 : i64, scratch_operands = 0 : i64, tpu.core_type = #tpu.core_type<tc>, window_params = [{transform_indices = @transform_0, window_bounds = array<i64: 8, 128>}, {transform_indices = @transform_1, window_bounds = array<i64: 128, 128>}, {transform_indices = @transform_2, window_bounds = array<i64: 8, 128>}]} {
    %c0_i32 = arith.constant 0 : i32
    %0 = arith.cmpi eq, %arg2, %c0_i32 : i32
    %1 = arith.extui %0 : i1 to i32
    %c0_i32_0 = arith.constant 0 : i32
    %2 = arith.cmpi ne, %1, %c0_i32_0 : i32
    scf.if %2 {
      %cst_8 = arith.constant 0.000000e+00 : f32
      %9 = vector.broadcast %cst_8 : f32 to vector<8x128xf32>
      %c0_9 = arith.constant 0 : index
      %c0_10 = arith.constant 0 : index
      %10 = vector.load %arg5[%c0_9, %c0_10] : memref<8x128xf32, #tpu.memory_space<vmem>>, vector<8x128xf32>
      tpu.vector_store %arg5[%c0_9, %c0_10], %9 {strides = array<i32>} : memref<8x128xf32, #tpu.memory_space<vmem>>, vector<8x128xf32>,
    } else {
    }
    %c0 = arith.constant 0 : index
    %c0_1 = arith.constant 0 : index
    %3 = vector.load %arg3[%c0, %c0_1] : memref<8x128xf32, #tpu.memory_space<vmem>>, vector<8x128xf32>
    %c0_2 = arith.constant 0 : index
    %c0_3 = arith.constant 0 : index
    %4 = vector.load %arg4[%c0_2, %c0_3] : memref<128x128xf32, #tpu.memory_space<vmem>>, vector<128x128xf32>
    %c0_4 = arith.constant 0 : index
    %c0_5 = arith.constant 0 : index
    %5 = vector.load %arg5[%c0_4, %c0_5] : memref<8x128xf32, #tpu.memory_space<vmem>>, vector<8x128xf32>
    %cst = arith.constant dense<0.000000e+00> : vector<8x128xf32>
    %6 = tpu.matmul %3, %4, %cst {dimension_numbers = #tpu.dot_dimension_numbers<[1], [0], [0], [1], [0, 0, 1, 1], [], []>} : vector<8x128xf32>, vector<128x128xf32>, vector<8x128xf32> -> vector<8x128xf32>
    %7 = arith.addf %5, %6 : vector<8x128xf32>
    %c0_6 = arith.constant 0 : index
    %c0_7 = arith.constant 0 : index
    %8 = vector.load %arg5[%c0_6, %c0_7] : memref<8x128xf32, #tpu.memory_space<vmem>>, vector<8x128xf32>
    tpu.vector_store %arg5[%c0_6, %c0_7], %7 {strides = array<i32>} : memref<8x128xf32, #tpu.memory_space<vmem>>, vector<8x128xf32>,
    return
  }
  func.func @transform_0(%arg0: i32, %arg1: i32, %arg2: i32) -> (i32, i32) {
    %c0_i32 = arith.constant 0 : i32
    return %arg0, %arg2 : i32, i32
  }
  func.func @transform_1(%arg0: i32, %arg1: i32, %arg2: i32) -> (i32, i32) {
    %c0_i32 = arith.constant 0 : i32
    return %arg2, %arg1 : i32, i32
  }
  func.func @transform_2(%arg0: i32, %arg1: i32, %arg2: i32) -> (i32, i32) {
    %c0_i32 = arith.constant 0 : i32
    return %arg0, %arg1 : i32, i32
  }
}

</mosaic_0001>

<bundles_post_ra>
// kernel: tpu_custom_call.1
= control target key start
LH: loop header
LB: loop body
LE: loop exit
PB: predicated region body
PF: predicated region fallthrough
CT: control target
= control target key end

     0   :  { %7 = vsyncpa [#allocation3], 0  ;;  %s371_s0 = inlined_call_operand.hbm [shape: f32[8,128], index: 0, kind: input, shape index: {}]   ;;  %s372_s1 = inlined_call_operand.hbm [shape: f32[128,128], index: 1, kind: input, shape index: {}]   ;;  %s373_s2 = inlined_call_operand.hbm [shape: f32[8,128], index: 2, kind: output, shape index: {}]  }
   0x1   :  { %8 = vsyncpa [#allocation6], 0 }
   0x2   :  { %9 = vsyncpa [#allocation4], 0  ;;  %s305_s9 = smov [#allocation2]   ;;  %s306_s11 = smov [#allocation5]  }
   0x3   :  { %s16_s10 = sshll.u32 %s305_s9, 4  ;;  %s25_s12 = sshll.u32 %s306_s11, 4  ;;  %s17_s10 = int_to_ptr.vmem [resolvable:$true] %s16_s10  ;;  %s328_s12 = int_to_ptr.vmem [resolvable:$true] %s25_s12 }
   0x4   :  { %s233_s15 = scalar_lea.hbm %s371_s0, 128 }
   0x5   :  { %p234_p0 = scmp.ne.s32.totalorder %s371_s0, %s233_s15  ;;  %p237_p1 = scmp.lt.u32.totalorder %s233_s15, %s371_s0 }
   0x7   :  { %p239_p2 = pnand %p237_p1, %p234_p0 }
   0x9   :  { %242 = shalt.err (!%p239_p2)
}
   0xa   :  { %s243_s20 = scalar_lea.vmem %s17_s10, 128  ;;  %p248_p4 = scmp.lt.s32.totalorder %s17_s10, %s17_s10 }
   0xb   :  { %p244_p3 = scmp.ne.s32.totalorder %s17_s10, %s243_s20  ;;  %p249_p5 = scmp.lt.s32.totalorder %s243_s20, %s243_s20 }
   0xd   :  { %p250_p6 = por %p249_p5, %p248_p4 }
   0xf   :  { %p251_p7 = pnand %p250_p6, %p244_p3 }
  0x11   :  { %254 = shalt.err (!%p251_p7)
}
  0x12   :  { %19 = dma.hbm_to_vmem [thread:$0]  %s371_s0, 128, %s17_s10, [#allocation3]  }
  0x13   :  { %s255_s25 = scalar_lea.hbm %s372_s1, 2048 }
  0x14   :  { %p256_p8 = scmp.ne.s32.totalorder %s372_s1, %s255_s25  ;;  %p259_p9 = scmp.lt.u32.totalorder %s255_s25, %s372_s1 }
  0x16   :  { %p261_p10 = pnand %p259_p9, %p256_p8 }
  0x18   :  { %264 = shalt.err (!%p261_p10)
}
  0x19   :  { %s265_s30 = scalar_lea.vmem %s328_s12, 2048  ;;  %p270_p12 = scmp.lt.s32.totalorder %s328_s12, %s328_s12 }
  0x1a   :  { %p266_p11 = scmp.ne.s32.totalorder %s328_s12, %s265_s30  ;;  %p271_p13 = scmp.lt.s32.totalorder %s265_s30, %s265_s30 }
  0x1c   :  { %p272_p0 = por %p271_p13, %p270_p12 }
  0x1e   :  { %p273_p1 = pnand %p272_p0, %p266_p11 }
  0x20   :  { %276 = shalt.err (!%p273_p1)
}
  0x21   :  { %s307_s0 = smov 128   ;;  %s308_s3 = smov 8  }
  0x22   :  { %31 = dma.hbm_to_vmem [thread:$0]  %s372_s1, 2048, %s328_s12, [#allocation6], %s307_s0, %s307_s0, %s308_s3  }
  0x23   :  { %299 = dma.done.wait [#allocation3], 128  }
  0x24   :  { %300 = vsyncadd [#allocation3], 4294967168 }
  0x25   :  { %301 = dma.done.wait [#allocation6], 2048  }
  0x26   :  { %302 = vsyncadd [#allocation6], 4294965248  ;;  %v309_v0 = vmov 0.0|0.0   ;;  %vm310_vm0 = vmmov 0   ;;  %v311_v1 = vmov 0.0   ;;  %v44_v2 = vld [vmem:[#allocation5] sm:$0xff] }
  0x27   :  { %201 = vmatprep.subr.bf16.mxu0 %v309_v0  ;;  %198 = vmatprep.mubr.msk.f32.mxu0 %vm310_vm0, %v311_v1  ;;  %v45_v3 = vld [vmem:[#allocation5 + $0x8] sm:$0xff]  ;;  %v46_v4 = vld [vmem:[#allocation5 + $0x10] sm:$0xff]  ;;  %v47_v6 = vld [vmem:[#allocation5 + $0x18] sm:$0xff]  ;;  %s312_s1 = smov [#allocation7]  }
  0x28   :  { %v202_v5 = vpack.c.bf16 %v45_v3, %v44_v2  ;;  %v205_v7 = vpack.c.bf16 %v47_v6, %v46_v4  ;;  %v48_v8 = vld [vmem:[#allocation5 + $0x20] sm:$0xff]  ;;  %v49_v9 = vld [vmem:[#allocation5 + $0x28] sm:$0xff]  ;;  %v50_v11 = vld [vmem:[#allocation5 + $0x30] sm:$0xff]  ;;  %s139_s6 = sshll.u32 %s312_s1, 4  ;;  %s140_s6 = int_to_ptr.vmem [resolvable:$true] %s139_s6 }
  0x29   :  { %v208_v10 = vpack.c.bf16 %v49_v9, %v48_v8  ;;  %v51_v12 = vld [vmem:[#allocation5 + $0x38] sm:$0xff]  ;;  %v52_v14 = vld [vmem:[#allocation5 + $0x40] sm:$0xff]  ;;  %v53_v15 = vld [vmem:[#allocation5 + $0x48] sm:$0xff]  ;;  %s277_s7 = scalar_lea.vmem %s140_s6, 128  ;;  %p282_p3 = scmp.lt.s32.totalorder %s140_s6, %s140_s6 }
  0x2a   :  { %203 = vmatpush3.bf16.msra.mxu0 %v202_v5  ;;  %v211_v13 = vpack.c.bf16 %v51_v12, %v50_v11  ;;  %v214_v16 = vpack.c.bf16 %v53_v15, %v52_v14  ;;  %v54_v17 = vld [vmem:[#allocation5 + $0x50] sm:$0xff]  ;;  %v55_v18 = vld [vmem:[#allocation5 + $0x58] sm:$0xff]  ;;  %v56_v20 = vld [vmem:[#allocation5 + $0x60] sm:$0xff]  ;;  %p278_p2 = scmp.ne.s32.totalorder %s140_s6, %s277_s7  ;;  %p283_p4 = scmp.lt.s32.totalorder %s277_s7, %s277_s7 }
  0x2b   :  { %204 = vmatprep.subr.bf16.mxu0 %v309_v0  ;;  %v217_v19 = vpack.c.bf16 %v55_v18, %v54_v17  ;;  %v57_v21 = vld [vmem:[#allocation5 + $0x68] sm:$0xff]  ;;  %v58_v23 = vld [vmem:[#allocation5 + $0x70] sm:$0xff]  ;;  %v59_v24 = vld [vmem:[#allocation5 + $0x78] sm:$0xff] }
  0x2c   :  { %v220_v22 = vpack.c.bf16 %v57_v21, %v56_v20  ;;  %v223_v25 = vpack.c.bf16 %v59_v24, %v58_v23  ;;  %v43_v26 = vld [vmem:[#allocation2] sm:$0xff]  ;;  %p284_p5 = por %p283_p4, %p282_p3 }
  0x2e   :  { %206 = vmatpush3.bf16.msra.mxu0 %v205_v7  ;;  %p285_p6 = pnand %p284_p5, %p278_p2 }
  0x2f   :  { %207 = vmatprep.subr.bf16.mxu0 %v309_v0 }
  0x32   :  { %209 = vmatpush3.bf16.msra.mxu0 %v208_v10 }
  0x33   :  { %210 = vmatprep.subr.bf16.mxu0 %v309_v0 }
  0x36   :  { %212 = vmatpush3.bf16.msra.mxu0 %v211_v13 }
  0x37   :  { %213 = vmatprep.subr.bf16.mxu0 %v309_v0 }
  0x3a   :  { %215 = vmatpush3.bf16.msra.mxu0 %v214_v16 }
  0x3b   :  { %216 = vmatprep.subr.bf16.mxu0 %v309_v0 }
  0x3e   :  { %218 = vmatpush3.bf16.msra.mxu0 %v217_v19 }
  0x3f   :  { %219 = vmatprep.subr.bf16.mxu0 %v309_v0 }
  0x42   :  { %221 = vmatpush3.bf16.msra.mxu0 %v220_v22 }
  0x43   :  { %222 = vmatprep.subr.bf16.mxu0 %v309_v0 }
  0x46   :  { %224 = vmatpush3.bf16.msra.mxu0 %v223_v25 }
  0x49   :  { %199 = vmatmul.mubr.f32.vlgmr.msra.gmra.mrb[0].mxu0 %v43_v26 }
 0x11c   :  { %v127_v27 = vpop.f32.mrb[0].mxu0 }
 0x11d   :  { %v200_v28 = vpop.f32.mrb[1].mxu0  ;;  %132 = vst [vmem:[#allocation7] sm:$0xff] %v127_v27 }
 0x11e   :  { %288 = shalt.err (!%p285_p6)
}
 0x11f   :  { %s289_s10 = scalar_lea.hbm %s373_s2, 128 }
 0x120   :  { %p290_p7 = scmp.ne.s32.totalorder %s373_s2, %s289_s10  ;;  %p293_p8 = scmp.lt.u32.totalorder %s289_s10, %s373_s2 }
 0x122   :  { %p295_p9 = pnand %p293_p8, %p290_p7 }
 0x124   :  { %298 = shalt.err (!%p295_p9)
}
 0x125   :  { %142 = dma.vmem_to_hbm [thread:$0]  %s140_s6, 128, %s373_s2, [#allocation4]  }
 0x126   :  { %303 = dma.done.wait [#allocation4], 128  }
 0x127   :  { %304 = vsyncadd [#allocation4], 4294967168 }
 0x128   :  { %146 = vsyncpa [#allocation3], 1 }
 0x129   :  { %147 = vsyncpa [#allocation6], 1 }
 0x12a   :  { %148 = vsyncpa [#allocation4], 1 }

</bundles_post_ra>
